<compile_context>
chip_gen: v6e
topology: v6e:2x2x1
jax: 0.10.0
libtpu: 0.0.40
codegen_flags: <defaults>
</compile_context>

<pallas_src>
import jax
import jax.numpy as jnp
import numpy as np
from jax.experimental import pallas as pl
from jax.experimental.pallas import tpu as pltpu

# ---- model configuration (matches the module __init__ used here) -----------
NET_DEPTH = 4          # trunk depth
NET_WIDTH = 32         # trunk width
NET_DEPTH_COND = 1     # view-conditioned depth
NET_WIDTH_COND = 16    # view-conditioned width
SKIP_INDEX = 2
NUM_RGB = 3
NUM_DENSITY = 1
XYZ_DIM = 6
VIEW_DIM = 4

# ---- packed layout: 4 row-chunks side by side in the 128-lane vreg ---------
CH = 4                         # lane chunks per packed row
IN_BLK = 8                     # padded xyz / view width per chunk
HID_BLK = NET_WIDTH            # 32 hidden lanes per chunk
OUT_W = NUM_RGB + NUM_DENSITY  # fused [rgb | density] per chunk
_SLAB_COLS = CH * HID_BLK      # 128 lanes
X_LANES = CH * IN_BLK          # 32 packed input lanes
OUT_LANES = CH * OUT_W         # 16 packed output lanes

# block-diagonal bf16 weight-slab row offsets (all multiples of 8)
_OFF_W0 = 0
_OFF_W1 = _OFF_W0 + CH * IN_BLK      # 32
_OFF_W2 = _OFF_W1 + CH * HID_BLK     # 160
_OFF_W3H = _OFF_W2 + CH * HID_BLK    # 288
_OFF_W3X = _OFF_W3H + CH * HID_BLK   # 416
_OFF_WE = _OFF_W3X + CH * IN_BLK     # 448
_OFF_WVB = _OFF_WE + CH * HID_BLK    # 576
_OFF_WVV = _OFF_WVB + CH * HID_BLK   # 704
_OFF_WOH = _OFF_WVV + CH * IN_BLK    # 736  (color head)
_OFF_WOT = _OFF_WOH + CH * HID_BLK   # 864  (density head)
_SLAB_ROWS = _OFF_WOT + CH * HID_BLK  # 992
_BIAS_ROWS = 8


def _round_up(a, m):
    return (a + m - 1) // m * m


# ------------------------- deterministic parameter init ---------------------
def _linear_params(key, din, dout):
    """Xavier-uniform weight [in, out] + PyTorch-style uniform bias [1, out]."""
    kw, kb = jax.random.split(key)
    bound = (6.0 / (din + dout)) ** 0.5
    W = jax.random.uniform(kw, (din, dout), jnp.float32, -bound, bound)
    bb = 1.0 / (din ** 0.5)
    b = jax.random.uniform(kb, (1, dout), jnp.float32, -bb, bb)
    return W, b


def init_params(key):
    """Returns list of (W, b) in module order: trunk, density, extra, view, color."""
    params = []
    keys = jax.random.split(key, NET_DEPTH + 3 + NET_DEPTH_COND)
    ki = 0
    for i in range(NET_DEPTH):                      # trunk layers
        if i == 0:
            din = XYZ_DIM
        elif (i - 1) % SKIP_INDEX == 0 and i > 1:
            din = NET_WIDTH + XYZ_DIM
        else:
            din = NET_WIDTH
        params.append(_linear_params(keys[ki], din, NET_WIDTH)); ki += 1
    params.append(_linear_params(keys[ki], NET_WIDTH, NUM_DENSITY)); ki += 1   # density
    params.append(_linear_params(keys[ki], NET_WIDTH, NET_WIDTH)); ki += 1     # extra
    for i in range(NET_DEPTH_COND):                 # view-conditioned layers
        din = NET_WIDTH + VIEW_DIM if i == 0 else NET_WIDTH_COND
        params.append(_linear_params(keys[ki], din, NET_WIDTH_COND)); ki += 1
    params.append(_linear_params(keys[ki], NET_WIDTH_COND, NUM_RGB)); ki += 1  # color
    return params


# ----------------------------- parameter packing ----------------------------
def pack_params(params):
    """Pack all (W, b) as 4-way block-diagonal blocks into one bf16 weight slab
    [992, 128] and one f32 bias slab [8, 128].

    Chunk c of a packed activation uses lanes [32c, 32c+32) (inputs use
    [8c, 8c+8)); each weight block replicates the dense weight on the diagonal.
    The skip-layer weight is split into (W3_h, W3_x); the first view-layer
    weight into (W_bottleneck, W_view); the color head writes lanes 4c..4c+2
    and the density head lane 4c+3 so the final output is one [rows/4, 16] write.
    """
    (W0, b0), (W1, b1), (W2, b2), (W3, b3), (Wd, bd), (We, be), (Wv, bv), (Wc, bc) = params
    assert W3.shape == (NET_WIDTH + XYZ_DIM, NET_WIDTH)
    assert Wv.shape == (NET_WIDTH + VIEW_DIM, NET_WIDTH_COND)

    W3h, W3x = W3[:NET_WIDTH], W3[NET_WIDTH:]      # skip-concat split
    Wvb, Wvv = Wv[:NET_WIDTH], Wv[NET_WIDTH:]      # [bottleneck | view] split

    def bd_block(w, in_blk, out_blk, col_off=0):
        k, n = w.shape
        out = jnp.zeros((CH * in_blk, _SLAB_COLS), jnp.float32)
        for c in range(CH):
            out = out.at[c * in_blk:c * in_blk + k,
                         c * out_blk + col_off:c * out_blk + col_off + n].set(w)
        return out

    blocks = [
        bd_block(W0, IN_BLK, HID_BLK),                    # _OFF_W0
        bd_block(W1, HID_BLK, HID_BLK),                   # _OFF_W1
        bd_block(W2, HID_BLK, HID_BLK),                   # _OFF_W2
        bd_block(W3h, HID_BLK, HID_BLK),                  # _OFF_W3H
        bd_block(W3x, IN_BLK, HID_BLK),                   # _OFF_W3X
        bd_block(We, HID_BLK, HID_BLK),                   # _OFF_WE
        bd_block(Wvb, HID_BLK, HID_BLK),                  # _OFF_WVB (cols 16..31/chunk stay 0)
        bd_block(Wvv, IN_BLK, HID_BLK),                   # _OFF_WVV (cols 16..31/chunk stay 0)
        bd_block(Wc, HID_BLK, OUT_W),                     # _OFF_WOH (rgb -> lanes 4c..4c+2)
        bd_block(Wd, HID_BLK, OUT_W, col_off=NUM_RGB),    # _OFF_WOT (density -> lane 4c+3)
    ]
    w_slab = jnp.concatenate(blocks, axis=0).astype(jnp.bfloat16)
    assert w_slab.shape == (_SLAB_ROWS, _SLAB_COLS)

    def bd_bias(b, out_blk, col_off=0):
        v = b.reshape(-1)
        row = jnp.zeros((_SLAB_COLS,), jnp.float32)
        for c in range(CH):
            row = row.at[c * out_blk + col_off:c * out_blk + col_off + v.shape[0]].set(v)
        return row

    b_slab = jnp.stack([
        bd_bias(b0, HID_BLK), bd_bias(b1, HID_BLK), bd_bias(b2, HID_BLK),
        bd_bias(b3, HID_BLK), bd_bias(be, HID_BLK), bd_bias(bv, HID_BLK),
        bd_bias(bc, OUT_W) + bd_bias(bd, OUT_W, col_off=NUM_RGB),
        jnp.zeros((_SLAB_COLS,), jnp.float32),
    ], axis=0)
    assert b_slab.shape == (_BIAS_ROWS, _SLAB_COLS)

    # Fused-head correctness relies on lanes [32c+16, 32c+32) of the view-layer
    # activation being exactly zero (zero weight/bias columns through ReLU) and
    # on the matching zero rows of the color head.  Verify when concrete.
    try:
        ws = np.asarray(w_slab.astype(jnp.float32))
        bs = np.asarray(b_slab)
    except Exception:  # inside jit / abstract values: skip the value checks
        ws = bs = None
    if ws is not None:
        for c in range(CH):
            lo, hi = c * HID_BLK + NET_WIDTH_COND, (c + 1) * HID_BLK
            assert np.all(ws[_OFF_WVB:_OFF_WVB + CH * HID_BLK, lo:hi] == 0)
            assert np.all(ws[_OFF_WVV:_OFF_WVV + CH * IN_BLK, lo:hi] == 0)
            assert np.all(ws[_OFF_WOH + lo:_OFF_WOH + hi, :] == 0)
            assert np.all(bs[5, lo:hi] == 0)
    return w_slab, b_slab


# --------------------------------- kernel -----------------------------------
def make_mlp_kernel(tb4_pad, s_pad, rows4):
    f32, bf16 = jnp.float32, jnp.bfloat16

    def kernel(x_ref, view_ref, w_ref, b_ref, out_ref):
        def mm(a, off, k):   # bf16 x bf16 block-diagonal weights, f32 MXU accumulation
            return jnp.dot(a, w_ref[off:off + k, :], preferred_element_type=f32)

        def bias(r):
            return b_ref[r:r + 1, :]

        x = x_ref[...]                                               # (rows4, 32) bf16

        # Trunk (depth 4); skip concat replaced by a split matmul at layer 3.
        h = jnp.maximum(mm(x, _OFF_W0, X_LANES) + bias(0), 0.0).astype(bf16)
        h = jnp.maximum(mm(h, _OFF_W1, _SLAB_COLS) + bias(1), 0.0).astype(bf16)
        h = jnp.maximum(mm(h, _OFF_W2, _SLAB_COLS) + bias(2), 0.0).astype(bf16)
        h = jnp.maximum(mm(h, _OFF_W3H, _SLAB_COLS) + mm(x, _OFF_W3X, X_LANES)
                        + bias(3), 0.0).astype(bf16)                 # (rows4, 128)

        # Bottleneck (extra layer, linear).
        bott = (mm(h, _OFF_WE, _SLAB_COLS) + bias(4)).astype(bf16)

        # Replicate the per-batch packed view rows to per-sample rows with a tiny
        # exact bf16 one-hot select (rows4 x tb4_pad x 32), then one block-diag
        # matmul.  This replaces the old large f32 one-hot replication matmul.
        ri = jax.lax.broadcasted_iota(jnp.int32, (rows4, tb4_pad), 0)
        bi = jax.lax.broadcasted_iota(jnp.int32, (rows4, tb4_pad), 1)
        lo = bi * s_pad
        rep = jnp.logical_and(ri >= lo, ri < lo + s_pad)
        rep = rep.astype(f32).astype(bf16)                           # 0/1 exact in bf16
        v_rows = jnp.dot(rep, view_ref[...],
                         preferred_element_type=f32).astype(bf16)    # (rows4, 32)
        vterm = mm(v_rows, _OFF_WVV, X_LANES)                        # (rows4, 128) f32

        # View-conditioned layer (net_depth_condition == 1).
        hv = jnp.maximum(mm(bott, _OFF_WVB, _SLAB_COLS) + vterm + bias(5),
                         0.0).astype(bf16)

        # Fused heads: per chunk c, lanes 4c..4c+2 = rgb, lane 4c+3 = density.
        out32 = mm(hv, _OFF_WOH, _SLAB_COLS) + mm(h, _OFF_WOT, _SLAB_COLS) + bias(6)
        out_ref[...] = out32[:, :OUT_LANES]

    return kernel


# -------------------------------- wrapper ------------------------------------
def _choose_tiling(B, s_pad, target_rows):
    """Pick (tile_b, B_pad): tile_b % 4 == 0, B_pad % tile_b == 0, about
    `target_rows` rows per grid step, >= 2 grid steps whenever the batch allows
    (v7x megacore), and minimal batch padding (prefer divisors of the batch)."""
    B4 = _round_up(B, 4)
    cap = max(4, min(B4, (target_rows // s_pad) // 4 * 4))
    if B4 >= 8:                                   # keep at least 2 grid steps
        cap = max(4, min(cap, (B4 // 2) // 4 * 4))
    tile_b = 4
    for t in range(cap, 3, -4):                   # largest multiple-of-4 divisor <= cap
        if B4 % t == 0:
            tile_b = t
            break
    if 2 * tile_b < cap:                          # divisor too small: pad a little instead
        tile_b = cap
    return tile_b, _round_up(B4, tile_b)


def mlp_forward(x, view_direction, params, target_rows=4096):
    """x: [batch, num_samples, XYZ_DIM] f32; view_direction: [batch, VIEW_DIM] f32."""
    B, S, F = x.shape
    assert F == XYZ_DIM and view_direction.shape == (B, VIEW_DIM)

    s_pad = _round_up(S, 8)
    tile_b, B_pad = _choose_tiling(B, s_pad, target_rows)
    grid = B_pad // tile_b
    rows = tile_b * s_pad                  # logical rows per grid step
    rows4 = rows // CH                     # packed rows per grid step (multiple of 8)
    tb4 = tile_b // CH                     # batches per lane chunk
    tb4_pad = _round_up(tb4, 8)            # sublane-aligned view block
    n_pad = B_pad * s_pad

    # bf16 inputs, zero-padded; 4 row-chunks of each tile packed along lanes.
    xp = jnp.zeros((B_pad, s_pad, IN_BLK), jnp.bfloat16)
    xp = xp.at[:B, :S, :XYZ_DIM].set(x.astype(jnp.bfloat16))
    x_packed = (xp.reshape(grid, CH, rows4, IN_BLK)
                  .transpose(0, 2, 1, 3)
                  .reshape(grid * rows4, X_LANES))

    vp = jnp.zeros((B_pad, IN_BLK), jnp.bfloat16)
    vp = vp.at[:B, :VIEW_DIM].set(view_direction.astype(jnp.bfloat16))
    v_packed = vp.reshape(grid, CH, tb4, IN_BLK).transpose(0, 2, 1, 3)
    v_packed = jnp.pad(v_packed, ((0, 0), (0, tb4_pad - tb4), (0, 0), (0, 0)))
    v_packed = v_packed.reshape(grid * tb4_pad, X_LANES)

    w_slab, b_slab = pack_params(params)

    out_packed = pl.pallas_call(
        make_mlp_kernel(tb4_pad, s_pad, rows4),
        out_shape=jax.ShapeDtypeStruct((grid * rows4, OUT_LANES), jnp.float32),
        grid_spec=pltpu.PrefetchScalarGridSpec(
            num_scalar_prefetch=0,
            grid=(grid,),
            in_specs=[
                pl.BlockSpec((rows4, X_LANES), lambda i: (i, 0)),
                pl.BlockSpec((tb4_pad, X_LANES), lambda i: (i, 0)),
                pl.BlockSpec((_SLAB_ROWS, _SLAB_COLS), lambda i: (0, 0)),
                pl.BlockSpec((_BIAS_ROWS, _SLAB_COLS), lambda i: (0, 0)),
            ],
            out_specs=pl.BlockSpec((rows4, OUT_LANES), lambda i: (i, 0)),
        ),
        compiler_params=pltpu.CompilerParams(
            dimension_semantics=("parallel",)),
    )(x_packed, v_packed, w_slab, b_slab)

    out_flat = (out_packed.reshape(grid, rows4, CH, OUT_W)
                          .transpose(0, 2, 1, 3)
                          .reshape(n_pad, OUT_W))
    out = out_flat.reshape(B_pad, s_pad, OUT_W)[:B, :S]
    rgb = out[..., :NUM_RGB]
    density = out[..., NUM_RGB:NUM_RGB + NUM_DENSITY]
    return rgb, density


# --------------------------- plain-JAX reference ------------------------------
def mlp_reference(x, view_direction, params):
    """Reference mirroring the kernel's bf16-weight / f32-accumulation math."""
    bf16, f32 = jnp.bfloat16, jnp.float32
    cast = [(W.astype(bf16), b.astype(f32)) for (W, b) in params]
    (W0, b0), (W1, b1), (W2, b2), (W3, b3), (Wd, bd), (We, be), (Wv, bv), (Wc, bc) = cast

    def lin(h, W, b):
        return jnp.dot(h, W, preferred_element_type=f32) + b

    xb = x.astype(bf16)
    h = jnp.maximum(lin(xb, W0, b0), 0.0).astype(bf16)
    h = jnp.maximum(lin(h, W1, b1), 0.0).astype(bf16)
    h = jnp.maximum(lin(h, W2, b2), 0.0).astype(bf16)
    h = jnp.maximum(lin(jnp.concatenate([h, xb], axis=-1), W3, b3), 0.0).astype(bf16)
    density = lin(h, Wd, bd)
    bott = lin(h, We, be).astype(bf16)
    vb = jnp.broadcast_to(view_direction.astype(bf16)[:, None, :],
                          (x.shape[0], x.shape[1], VIEW_DIM))
    hv = jnp.maximum(lin(jnp.concatenate([bott, vb], axis=-1), Wv, bv),
                     0.0).astype(bf16)
    rgb = lin(hv, Wc, bc)
    return rgb, density


# ----------------------------------- main -------------------------------------
if __name__ == "__main__":
    key = jax.random.PRNGKey(0)
    _, _, kp = jax.random.split(key, 3)
    params = init_params(kp)

    def check(b, s, seed):
        kx2, kv2 = jax.random.split(jax.random.PRNGKey(seed))
        x = jax.random.normal(kx2, (b, s, XYZ_DIM), jnp.float32)
        v = jax.random.normal(kv2, (b, VIEW_DIM), jnp.float32)
        rgb, density = mlp_forward(x, v, params)
        jax.block_until_ready((rgb, density))
        rgb_ref, density_ref = mlp_reference(x, v, params)
        assert rgb.shape == (b, s, NUM_RGB)
        assert density.shape == (b, s, NUM_DENSITY)
        assert np.allclose(np.asarray(rgb), np.asarray(rgb_ref), atol=1e-2, rtol=1e-2)
        assert np.allclose(np.asarray(density), np.asarray(density_ref), atol=1e-2, rtol=1e-2)

    check(2, 8, 0)      # small canonical shapes (grid = 1)
    check(3, 11, 1)     # non-multiple shapes: batch + sample padding
    check(16, 10, 2)    # grid = 2, two batches per lane chunk (tb4 = 2)

    # TODO(synk): view_direction=None path (skip the view branch; color head applied
    # directly to the trunk output) is not implemented in this kernel variant.
    print("KERNEL_OK")
</pallas_src>

<mosaic_0001>
module attributes {stable_mosaic.version = 11 : i64} {
  func.func @kernel(%arg0: i32, %arg1: memref<8x32xbf16, #tpu.memory_space<vmem>>, %arg2: memref<8x32xbf16, #tpu.memory_space<vmem>>, %arg3: memref<992x128xbf16, #tpu.memory_space<vmem>>, %arg4: memref<8x128xf32, #tpu.memory_space<vmem>>, %arg5: memref<8x16xf32, #tpu.memory_space<vmem>>) attributes {dimension_semantics = [#tpu.dimension_semantics<parallel>], iteration_bounds = array<i64: 1>, scalar_prefetch = 0 : i64, scratch_operands = 0 : i64, tpu.core_type = #tpu.core_type<tc>, window_params = [{transform_indices = @transform_0, window_bounds = array<i64: 8, 32>}, {transform_indices = @transform_1, window_bounds = array<i64: 8, 32>}, {pipeline_mode = #tpu.pipeline_mode<synchronous>, transform_indices = @transform_2, window_bounds = array<i64: 992, 128>}, {pipeline_mode = #tpu.pipeline_mode<synchronous>, transform_indices = @transform_3, window_bounds = array<i64: 8, 128>}, {transform_indices = @transform_4, window_bounds = array<i64: 8, 16>}]} {
    %c0 = arith.constant 0 : index
    %c0_0 = arith.constant 0 : index
    %0 = vector.load %arg1[%c0, %c0_0] : memref<8x32xbf16, #tpu.memory_space<vmem>>, vector<8x32xbf16>
    %c0_1 = arith.constant 0 : index
    %c0_2 = arith.constant 0 : index
    %1 = vector.load %arg3[%c0_1, %c0_2] : memref<992x128xbf16, #tpu.memory_space<vmem>>, vector<32x128xbf16>
    %cst = arith.constant dense<0.000000e+00> : vector<8x128xf32>
    %2 = tpu.matmul %0, %1, %cst {dimension_numbers = #tpu.dot_dimension_numbers<[1], [0], [0], [1], [0, 0, 1, 1], [], []>} : vector<8x32xbf16>, vector<32x128xbf16>, vector<8x128xf32> -> vector<8x128xf32>
    %c0_3 = arith.constant 0 : index
    %c0_4 = arith.constant 0 : index
    %3 = vector.load %arg4[%c0_3, %c0_4] : memref<8x128xf32, #tpu.memory_space<vmem>>, vector<1x128xf32>
    %4 = vector.broadcast %3 : vector<1x128xf32> to vector<8x128xf32>
    %5 = arith.addf %2, %4 : vector<8x128xf32>
    %cst_5 = arith.constant 0.000000e+00 : f32
    %6 = vector.broadcast %cst_5 : f32 to vector<8x128xf32>
    %7 = arith.maximumf %5, %6 : vector<8x128xf32>
    %8 = arith.truncf %7 : vector<8x128xf32> to vector<8x128xbf16>
    %c32 = arith.constant 32 : index
    %c0_6 = arith.constant 0 : index
    %9 = vector.load %arg3[%c32, %c0_6] : memref<992x128xbf16, #tpu.memory_space<vmem>>, vector<128x128xbf16>
    %cst_7 = arith.constant dense<0.000000e+00> : vector<8x128xf32>
    %10 = tpu.matmul %8, %9, %cst_7 {dimension_numbers = #tpu.dot_dimension_numbers<[1], [0], [0], [1], [0, 0, 1, 1], [], []>} : vector<8x128xbf16>, vector<128x128xbf16>, vector<8x128xf32> -> vector<8x128xf32>
    %c1 = arith.constant 1 : index
    %c0_8 = arith.constant 0 : index
    %11 = vector.load %arg4[%c1, %c0_8] : memref<8x128xf32, #tpu.memory_space<vmem>>, vector<1x128xf32>
    %12 = vector.broadcast %11 : vector<1x128xf32> to vector<8x128xf32>
    %13 = arith.addf %10, %12 : vector<8x128xf32>
    %cst_9 = arith.constant 0.000000e+00 : f32
    %14 = vector.broadcast %cst_9 : f32 to vector<8x128xf32>
    %15 = arith.maximumf %13, %14 : vector<8x128xf32>
    %16 = arith.truncf %15 : vector<8x128xf32> to vector<8x128xbf16>
    %c160 = arith.constant 160 : index
    %c0_10 = arith.constant 0 : index
    %17 = vector.load %arg3[%c160, %c0_10] : memref<992x128xbf16, #tpu.memory_space<vmem>>, vector<128x128xbf16>
    %cst_11 = arith.constant dense<0.000000e+00> : vector<8x128xf32>
    %18 = tpu.matmul %16, %17, %cst_11 {dimension_numbers = #tpu.dot_dimension_numbers<[1], [0], [0], [1], [0, 0, 1, 1], [], []>} : vector<8x128xbf16>, vector<128x128xbf16>, vector<8x128xf32> -> vector<8x128xf32>
    %c2 = arith.constant 2 : index
    %c0_12 = arith.constant 0 : index
    %19 = vector.load %arg4[%c2, %c0_12] : memref<8x128xf32, #tpu.memory_space<vmem>>, vector<1x128xf32>
    %20 = vector.broadcast %19 : vector<1x128xf32> to vector<8x128xf32>
    %21 = arith.addf %18, %20 : vector<8x128xf32>
    %cst_13 = arith.constant 0.000000e+00 : f32
    %22 = vector.broadcast %cst_13 : f32 to vector<8x128xf32>
    %23 = arith.maximumf %21, %22 : vector<8x128xf32>
    %24 = arith.truncf %23 : vector<8x128xf32> to vector<8x128xbf16>
    %c288 = arith.constant 288 : index
    %c0_14 = arith.constant 0 : index
    %25 = vector.load %arg3[%c288, %c0_14] : memref<992x128xbf16, #tpu.memory_space<vmem>>, vector<128x128xbf16>
    %cst_15 = arith.constant dense<0.000000e+00> : vector<8x128xf32>
    %26 = tpu.matmul %24, %25, %cst_15 {dimension_numbers = #tpu.dot_dimension_numbers<[1], [0], [0], [1], [0, 0, 1, 1], [], []>} : vector<8x128xbf16>, vector<128x128xbf16>, vector<8x128xf32> -> vector<8x128xf32>
    %c416 = arith.constant 416 : index
    %c0_16 = arith.constant 0 : index
    %27 = vector.load %arg3[%c416, %c0_16] : memref<992x128xbf16, #tpu.memory_space<vmem>>, vector<32x128xbf16>
    %cst_17 = arith.constant dense<0.000000e+00> : vector<8x128xf32>
    %28 = tpu.matmul %0, %27, %cst_17 {dimension_numbers = #tpu.dot_dimension_numbers<[1], [0], [0], [1], [0, 0, 1, 1], [], []>} : vector<8x32xbf16>, vector<32x128xbf16>, vector<8x128xf32> -> vector<8x128xf32>
    %29 = arith.addf %26, %28 : vector<8x128xf32>
    %c3 = arith.constant 3 : index
    %c0_18 = arith.constant 0 : index
    %30 = vector.load %arg4[%c3, %c0_18] : memref<8x128xf32, #tpu.memory_space<vmem>>, vector<1x128xf32>
    %31 = vector.broadcast %30 : vector<1x128xf32> to vector<8x128xf32>
    %32 = arith.addf %29, %31 : vector<8x128xf32>
    %cst_19 = arith.constant 0.000000e+00 : f32
    %33 = vector.broadcast %cst_19 : f32 to vector<8x128xf32>
    %34 = arith.maximumf %32, %33 : vector<8x128xf32>
    %35 = arith.truncf %34 : vector<8x128xf32> to vector<8x128xbf16>
    %c448 = arith.constant 448 : index
    %c0_20 = arith.constant 0 : index
    %36 = vector.load %arg3[%c448, %c0_20] : memref<992x128xbf16, #tpu.memory_space<vmem>>, vector<128x128xbf16>
    %cst_21 = arith.constant dense<0.000000e+00> : vector<8x128xf32>
    %37 = tpu.matmul %35, %36, %cst_21 {dimension_numbers = #tpu.dot_dimension_numbers<[1], [0], [0], [1], [0, 0, 1, 1], [], []>} : vector<8x128xbf16>, vector<128x128xbf16>, vector<8x128xf32> -> vector<8x128xf32>
    %c4 = arith.constant 4 : index
    %c0_22 = arith.constant 0 : index
    %38 = vector.load %arg4[%c4, %c0_22] : memref<8x128xf32, #tpu.memory_space<vmem>>, vector<1x128xf32>
    %39 = vector.broadcast %38 : vector<1x128xf32> to vector<8x128xf32>
    %40 = arith.addf %37, %39 : vector<8x128xf32>
    %41 = arith.truncf %40 : vector<8x128xf32> to vector<8x128xbf16>
    %42 = tpu.iota {dimensions = array<i32: 0>} : vector<8x8xi32>
    %43 = tpu.iota {dimensions = array<i32: 1>} : vector<8x8xi32>
    %c8_i32 = arith.constant 8 : i32
    %44 = vector.broadcast %c8_i32 : i32 to vector<8x8xi32>
    %45 = arith.muli %43, %44 : vector<8x8xi32>
    %46 = arith.cmpi sge, %42, %45 : vector<8x8xi32>
    %c8_i32_23 = arith.constant 8 : i32
    %47 = vector.broadcast %c8_i32_23 : i32 to vector<8x8xi32>
    %48 = arith.addi %45, %47 : vector<8x8xi32>
    %49 = arith.cmpi slt, %42, %48 : vector<8x8xi32>
    %50 = arith.andi %46, %49 : vector<8x8xi1>
    %51 = arith.extui %50 : vector<8x8xi1> to vector<8x8xi32>
    %52 = arith.sitofp %51 : vector<8x8xi32> to vector<8x8xf32>
    %53 = arith.truncf %52 : vector<8x8xf32> to vector<8x8xbf16>
    %c0_24 = arith.constant 0 : index
    %c0_25 = arith.constant 0 : index
    %54 = vector.load %arg2[%c0_24, %c0_25] : memref<8x32xbf16, #tpu.memory_space<vmem>>, vector<8x32xbf16>
    %cst_26 = arith.constant dense<0.000000e+00> : vector<8x32xf32>
    %55 = tpu.matmul %53, %54, %cst_26 {dimension_numbers = #tpu.dot_dimension_numbers<[1], [0], [0], [1], [0, 0, 1, 1], [], []>} : vector<8x8xbf16>, vector<8x32xbf16>, vector<8x32xf32> -> vector<8x32xf32>
    %56 = arith.truncf %55 : vector<8x32xf32> to vector<8x32xbf16>
    %c704 = arith.constant 704 : index
    %c0_27 = arith.constant 0 : index
    %57 = vector.load %arg3[%c704, %c0_27] : memref<992x128xbf16, #tpu.memory_space<vmem>>, vector<32x128xbf16>
    %cst_28 = arith.constant dense<0.000000e+00> : vector<8x128xf32>
    %58 = tpu.matmul %56, %57, %cst_28 {dimension_numbers = #tpu.dot_dimension_numbers<[1], [0], [0], [1], [0, 0, 1, 1], [], []>} : vector<8x32xbf16>, vector<32x128xbf16>, vector<8x128xf32> -> vector<8x128xf32>
    %c576 = arith.constant 576 : index
    %c0_29 = arith.constant 0 : index
    %59 = vector.load %arg3[%c576, %c0_29] : memref<992x128xbf16, #tpu.memory_space<vmem>>, vector<128x128xbf16>
    %cst_30 = arith.constant dense<0.000000e+00> : vector<8x128xf32>
    %60 = tpu.matmul %41, %59, %cst_30 {dimension_numbers = #tpu.dot_dimension_numbers<[1], [0], [0], [1], [0, 0, 1, 1], [], []>} : vector<8x128xbf16>, vector<128x128xbf16>, vector<8x128xf32> -> vector<8x128xf32>
    %61 = arith.addf %60, %58 : vector<8x128xf32>
    %c5 = arith.constant 5 : index
    %c0_31 = arith.constant 0 : index
    %62 = vector.load %arg4[%c5, %c0_31] : memref<8x128xf32, #tpu.memory_space<vmem>>, vector<1x128xf32>
    %63 = vector.broadcast %62 : vector<1x128xf32> to vector<8x128xf32>
    %64 = arith.addf %61, %63 : vector<8x128xf32>
    %cst_32 = arith.constant 0.000000e+00 : f32
    %65 = vector.broadcast %cst_32 : f32 to vector<8x128xf32>
    %66 = arith.maximumf %64, %65 : vector<8x128xf32>
    %67 = arith.truncf %66 : vector<8x128xf32> to vector<8x128xbf16>
    %c736 = arith.constant 736 : index
    %c0_33 = arith.constant 0 : index
    %68 = vector.load %arg3[%c736, %c0_33] : memref<992x128xbf16, #tpu.memory_space<vmem>>, vector<128x128xbf16>
    %cst_34 = arith.constant dense<0.000000e+00> : vector<8x128xf32>
    %69 = tpu.matmul %67, %68, %cst_34 {dimension_numbers = #tpu.dot_dimension_numbers<[1], [0], [0], [1], [0, 0, 1, 1], [], []>} : vector<8x128xbf16>, vector<128x128xbf16>, vector<8x128xf32> -> vector<8x128xf32>
    %c864 = arith.constant 864 : index
    %c0_35 = arith.constant 0 : index
    %70 = vector.load %arg3[%c864, %c0_35] : memref<992x128xbf16, #tpu.memory_space<vmem>>, vector<128x128xbf16>
    %cst_36 = arith.constant dense<0.000000e+00> : vector<8x128xf32>
    %71 = tpu.matmul %35, %70, %cst_36 {dimension_numbers = #tpu.dot_dimension_numbers<[1], [0], [0], [1], [0, 0, 1, 1], [], []>} : vector<8x128xbf16>, vector<128x128xbf16>, vector<8x128xf32> -> vector<8x128xf32>
    %72 = arith.addf %69, %71 : vector<8x128xf32>
    %c6 = arith.constant 6 : index
    %c0_37 = arith.constant 0 : index
    %73 = vector.load %arg4[%c6, %c0_37] : memref<8x128xf32, #tpu.memory_space<vmem>>, vector<1x128xf32>
    %74 = vector.broadcast %73 : vector<1x128xf32> to vector<8x128xf32>
    %75 = arith.addf %72, %74 : vector<8x128xf32>
    %76 = vector.extract_strided_slice %75 {offsets = [0, 0], sizes = [8, 16], strides = [1, 1]} : vector<8x128xf32> to vector<8x16xf32>
    %c0_38 = arith.constant 0 : index
    %c0_39 = arith.constant 0 : index
    %77 = vector.load %arg5[%c0_38, %c0_39] : memref<8x16xf32, #tpu.memory_space<vmem>>, vector<8x16xf32>
    tpu.vector_store %arg5[%c0_38, %c0_39], %76 {strides = array<i32>} : memref<8x16xf32, #tpu.memory_space<vmem>>, vector<8x16xf32>,
    return
  }
  func.func @transform_0(%arg0: i32) -> (i32, i32) {
    %c0_i32 = arith.constant 0 : i32
    %c0_i32_0 = arith.constant 0 : i32
    return %arg0, %c0_i32 : i32, i32
  }
  func.func @transform_1(%arg0: i32) -> (i32, i32) {
    %c0_i32 = arith.constant 0 : i32
    %c0_i32_0 = arith.constant 0 : i32
    return %arg0, %c0_i32 : i32, i32
  }
  func.func @transform_2(%arg0: i32) -> (i32, i32) {
    %c0_i32 = arith.constant 0 : i32
    %c0_i32_0 = arith.constant 0 : i32
    %c0_i32_1 = arith.constant 0 : i32
    return %c0_i32, %c0_i32_0 : i32, i32
  }
  func.func @transform_3(%arg0: i32) -> (i32, i32) {
    %c0_i32 = arith.constant 0 : i32
    %c0_i32_0 = arith.constant 0 : i32
    %c0_i32_1 = arith.constant 0 : i32
    return %c0_i32, %c0_i32_0 : i32, i32
  }
  func.func @transform_4(%arg0: i32) -> (i32, i32) {
    %c0_i32 = arith.constant 0 : i32
    %c0_i32_0 = arith.constant 0 : i32
    return %arg0, %c0_i32 : i32, i32
  }
}

</mosaic_0001>

<bundles_post_ra>
// kernel: tpu_custom_call.1
= control target key start
LH: loop header
LB: loop body
LE: loop exit
PB: predicated region body
PF: predicated region fallthrough
CT: control target
= control target key end

     0   :  { %9 = vsyncpa [#allocation3], 0  ;;  %s1745_s0 = inlined_call_operand.hbm [shape: bf16[8,32], index: 0, kind: input, shape index: {}]   ;;  %s1746_s1 = inlined_call_operand.hbm [shape: bf16[8,32], index: 1, kind: input, shape index: {}]   ;;  %s1747_s2 = inlined_call_operand.hbm [shape: bf16[992,128], index: 2, kind: input, shape index: {}]   ;;  %s1748_s3 = inlined_call_operand.hbm [shape: f32[8,128], index: 3, kind: input, shape index: {}]   ;;  %s1749_s4 = inlined_call_operand.hbm [shape: f32[8,16], index: 4, kind: output, shape index: {}]  }
   0x1   :  { %10 = vsyncpa [#allocation6], 0 }
   0x2   :  { %11 = vsyncpa [#allocation9], 0 }
   0x3   :  { %12 = vsyncpa [#allocation4], 0  ;;  %s1599_s15 = smov [#allocation5]   ;;  %s1600_s17 = smov [#allocation2]  }
   0x4   :  { %s29_s16 = sshll.u32 %s1599_s15, 4  ;;  %s19_s18 = sshll.u32 %s1600_s17, 4  ;;  %s30_s16 = int_to_ptr.vmem [resolvable:$true] %s29_s16  ;;  %s20_s18 = int_to_ptr.vmem [resolvable:$true] %s19_s18 }
   0x5   :  { %s1499_s19 = scalar_lea.vmem %s30_s16, 64  ;;  %p1504_p1 = scmp.lt.s32.totalorder %s30_s16, %s30_s16 }
   0x6   :  { %p1500_p0 = scmp.ne.s32.totalorder %s30_s16, %s1499_s19  ;;  %p1505_p2 = scmp.lt.s32.totalorder %s1499_s19, %s1499_s19 }
   0x8   :  { %p1506_p3 = por %p1505_p2, %p1504_p1 }
   0xa   :  { %p1507_p4 = pnand %p1506_p3, %p1500_p0 }
   0xc   :  { %1510 = shalt.err (!%p1507_p4)
}
   0xd   :  { %32 = dma.hbm_to_vmem [thread:$0]  %s1746_s1, 64, %s30_s16, [#allocation6]  }
   0xe   :  { %s1519_s22 = scalar_lea.vmem %s20_s18, 64  ;;  %p1524_p6 = scmp.lt.s32.totalorder %s20_s18, %s20_s18 }
   0xf   :  { %p1520_p5 = scmp.ne.s32.totalorder %s20_s18, %s1519_s22  ;;  %p1525_p7 = scmp.lt.s32.totalorder %s1519_s22, %s1519_s22 }
  0x11   :  { %p1526_p8 = por %p1525_p7, %p1524_p6 }
  0x13   :  { %p1527_p9 = pnand %p1526_p8, %p1520_p5 }
  0x15   :  { %1530 = shalt.err (!%p1527_p9)
}
  0x16   :  { %22 = dma.hbm_to_vmem [thread:$0]  %s1745_s0, 64, %s20_s18, [#allocation3]  }
  0x17   :  { %s1601_s25 = smov [#allocation7]  }
  0x18   :  { %s38_s26 = sshll.u32 %s1601_s25, 4  ;;  %s39_s26 = int_to_ptr.vmem [resolvable:$true] %s38_s26 }
  0x19   :  { %s1539_s27 = scalar_lea.vmem %s39_s26, 7936  ;;  %p1544_p11 = scmp.lt.s32.totalorder %s39_s26, %s39_s26 }
  0x1a   :  { %p1540_p10 = scmp.ne.s32.totalorder %s39_s26, %s1539_s27  ;;  %p1545_p12 = scmp.lt.s32.totalorder %s1539_s27, %s1539_s27 }
  0x1c   :  { %p1546_p13 = por %p1545_p12, %p1544_p11 }
  0x1e   :  { %p1547_p0 = pnand %p1546_p13, %p1540_p10 }
  0x20   :  { %1550 = shalt.err (!%p1547_p0)
}
  0x21   :  { %s1602_s1 = smov 64   ;;  %s1603_s28 = smov 4  }
  0x22   :  { %44 = dma.hbm_to_vmem [thread:$0]  %s1747_s2, 7936, %s39_s26, [#allocation6], %s1602_s1, %s1602_s1, %s1603_s28  }
  0x23   :  { %s1604_s5 = smov [#allocation8]  }
  0x24   :  { %s51_s6 = sshll.u32 %s1604_s5, 4  ;;  %s52_s6 = int_to_ptr.vmem [resolvable:$true] %s51_s6 }
  0x25   :  { %s1559_s0 = scalar_lea.vmem %s52_s6, 128  ;;  %p1564_p2 = scmp.lt.s32.totalorder %s52_s6, %s52_s6 }
  0x26   :  { %p1560_p1 = scmp.ne.s32.totalorder %s52_s6, %s1559_s0  ;;  %p1565_p3 = scmp.lt.s32.totalorder %s1559_s0, %s1559_s0 }
  0x28   :  { %p1566_p4 = por %p1565_p3, %p1564_p2 }
  0x2a   :  { %p1567_p5 = pnand %p1566_p4, %p1560_p1 }
  0x2c   :  { %1570 = shalt.err (!%p1567_p5)
}
  0x2d   :  { %54 = dma.hbm_to_vmem [thread:$0]  %s1748_s3, 128, %s52_s6, [#allocation9]  }
  0x2e   :  { %1591 = dma.done.wait [#allocation3], 64  }
  0x2f   :  { %1592 = vsyncadd [#allocation3], 4294967232 }
  0x30   :  { %1593 = dma.done.wait [#allocation6], 8000  }
  0x31   :  { %1594 = vsyncadd [#allocation6], 4294959296 }
  0x32   :  { %1595 = dma.done.wait [#allocation9], 128  }
  0x33   :  { %1596 = vsyncadd [#allocation9], 4294967168  ;;  %v1605_v0 = vmov 0.0   ;;  %vm1606_vm0 = vmmov 0   ;;  %v1429_v1 = vld [vmem:[#allocation7 + $0x8] sm:$0xff]   ;;  %v1430_v2 = vld [vmem:[#allocation7] sm:$0xff]  }
  0x34   :  { %1250 = vmatprep.subr.bf16.mxu1 %v1605_v0  ;;  %1254 = vmatprep.mubr.msk.bf16.mxu1 %vm1606_vm0, %v1605_v0  ;;  %v1652_v3 = vld [vmem:[#allocation2] sm:$0xf]  ;;  %vm90_vm1 = vcmask 261120   ;;  %v1431_v4 = vld [vmem:[#allocation7 + $0x48] sm:$0xff]   ;;  %v1432_v5 = vld [vmem:[#allocation7 + $0x40] sm:$0xff]   ;;  %vm653_vm2 = vcmask 1043456  }
  0x35   :  { %1278 = vmatprep.subr.bf16.mxu0 %v1605_v0  ;;  %1294 = vmatprep.mubr.msk.bf16.mxu0 %vm1606_vm0, %v1605_v0  ;;  %v1433_v6 = vld [vmem:[#allocation7 + $0x38] sm:$0xff]   ;;  %v1434_v7 = vld [vmem:[#allocation7 + $0x30] sm:$0xff]   ;;  %v1435_v8 = vld [vmem:[#allocation7 + $0x28] sm:$0xff]   ;;  %vm649_vm6 = vcmask 64512   ;;  %s1607_s2 = smov [#allocation10]   ;;  %vm1083_vm7 = vcmask 130048  }
  0x36   :  { %1251 = vmatpush3.bf16.msra.mxu1 %v1429_v1  ;;  %v1436_v9 = vld [vmem:[#allocation7 + $0x20] sm:$0xff]   ;;  %v1437_v10 = vld [vmem:[#allocation7 + $0x18] sm:$0xff]   ;;  %v1438_v11 = vld [vmem:[#allocation7 + $0x10] sm:$0xff]   ;;  %s1091_s3 = sshll.u32 %s1607_s2, 4  ;;  %s1092_s3 = int_to_ptr.vmem [resolvable:$true] %s1091_s3 }
  0x37   :  { %1252 = vmatprep.subr.bf16.mxu1 %v1605_v0  ;;  %v1439_v12 = vld [vmem:[#allocation7 + $0x88] sm:$0xff]   ;;  %v1440_v13 = vld [vmem:[#allocation7 + $0x80] sm:$0xff]   ;;  %v1441_v14 = vld [vmem:[#allocation7 + $0x78] sm:$0xff]   ;;  %s1571_s9 = scalar_lea.vmem %s1092_s3, 128  ;;  %p1576_p7 = scmp.lt.s32.totalorder %s1092_s3, %s1092_s3 }
  0x38   :  { %1279 = vmatpush3.bf16.msra.mxu0 %v1439_v12  ;;  %v1442_v15 = vld [vmem:[#allocation7 + $0x70] sm:$0xff]   ;;  %v1443_v16 = vld [vmem:[#allocation7 + $0x68] sm:$0xff]   ;;  %v1444_v17 = vld [vmem:[#allocation7 + $0x60] sm:$0xff]   ;;  %p1572_p6 = scmp.ne.s32.totalorder %s1092_s3, %s1571_s9  ;;  %p1577_p8 = scmp.lt.s32.totalorder %s1571_s9, %s1571_s9 }
  0x39   :  { %1280 = vmatprep.subr.bf16.mxu0 %v1605_v0  ;;  %v1102_v18 = vld [vmem:[#allocation8] ss:$0 sm:$0xff]  ;;  %v1445_v26 = vld [vmem:[#allocation7 + $0x58] sm:$0xff]   ;;  %v1106_v30 = vld [vmem:[#allocation8 + $0x1] ss:$0 sm:$0xff] }
  0x3a   :  { %1253 = vmatpush3.bf16.msra.mxu1 %v1430_v2  ;;  %v1446_v27 = vld [vmem:[#allocation7 + $0x50] sm:$0xff]   ;;  %v1452_v28 = vld [vmem:[#allocation7 + $0xd8] sm:$0xff]   ;;  %v1447_v36 = vld [vmem:[#allocation7 + $0xc8] sm:$0xff]   ;;  %p1578_p9 = por %p1577_p8, %p1576_p7 }
  0x3b   :  { %1258 = vmatprep.subr.bf16.mxu1 %v1605_v0  ;;  %v1454_v29 = vld [vmem:[#allocation7 + $0xd0] sm:$0xff]   ;;  %v1448_v39 = vld [vmem:[#allocation7 + $0xc0] sm:$0xff]   ;;  %v1449_v40 = vld [vmem:[#allocation7 + $0xb8] sm:$0xff]  }
  0x3c   :  { %1281 = vmatpush3.bf16.msra.mxu0 %v1440_v13  ;;  %v1450_v41 = vld [vmem:[#allocation7 + $0xb0] sm:$0xff]   ;;  %v1451_v42 = vld [vmem:[#allocation7 + $0xa8] sm:$0xff]   ;;  %v1453_v43 = vld [vmem:[#allocation7 + $0xa0] sm:$0xff]   ;;  %p1579_p10 = pnand %p1578_p9, %p1572_p6 }
  0x3d   :  { %1255 = vmatmul.mubr.msk.bf16.vlgmr.msra.gmra.mxu1 %vm90_vm1, %v1652_v3  ;;  %1282 = vmatprep.subr.bf16.mxu0 %v1605_v0  ;;  %v1455_v44 = vld [vmem:[#allocation7 + $0x98] sm:$0xff]   ;;  %v1456_v45 = vld [vmem:[#allocation7 + $0x90] sm:$0xff]   ;;  %v1459_v48 = vld [vmem:[#allocation7 + $0x108] sm:$0xff]  }
  0x3e   :  { %1259 = vmatpush3.bf16.msra.mxu1 %v1431_v4  ;;  %1274 = vmatprep.mubr.msk.bf16.mxu1 %vm1606_vm0, %v1605_v0  ;;  %v1457_v46 = vld [vmem:[#allocation7 + $0x118] sm:$0xff]   ;;  %v1458_v47 = vld [vmem:[#allocation7 + $0x110] sm:$0xff]   ;;  %v1460_v49 = vld [vmem:[#allocation7 + $0x100] sm:$0xff]  }
  0x3f   :  { %1260 = vmatprep.subr.bf16.mxu1 %v1605_v0  ;;  %v1461_v50 = vld [vmem:[#allocation7 + $0xf8] sm:$0xff]   ;;  %v1462_v51 = vld [vmem:[#allocation7 + $0xf0] sm:$0xff]   ;;  %v1463_v1 = vld [vmem:[#allocation7 + $0xe8] sm:$0xff]  }
  0x40   :  { %1283 = vmatpush3.bf16.msra.mxu0 %v1441_v14  ;;  %v1115_v56 = vld [vmem:[#allocation8 + $0x2] ss:$0 sm:$0xff]  ;;  %v1464_v2 = vld [vmem:[#allocation7 + $0xe0] sm:$0xff]   ;;  %v1135_v14 = vld [vmem:[#allocation8 + $0x3] ss:$0 sm:$0xff] }
  0x41   :  { %1284 = vmatprep.subr.bf16.mxu0 %v1605_v0  ;;  %v1466_v4 = vld [vmem:[#allocation7 + $0x150] sm:$0xff]  }
  0x42   :  { %1261 = vmatpush3.bf16.msra.mxu1 %v1432_v5  ;;  %v1467_v5 = vld [vmem:[#allocation7 + $0x148] sm:$0xff]  }
  0x43   :  { %1262 = vmatprep.subr.bf16.mxu1 %v1605_v0 }
  0x44   :  { %1285 = vmatpush3.bf16.msra.mxu0 %v1442_v15 }
  0x45   :  { %1286 = vmatprep.subr.bf16.mxu0 %v1605_v0 }
  0x46   :  { %1263 = vmatpush3.bf16.msra.mxu1 %v1433_v6  ;;  %v1468_v6 = vld [vmem:[#allocation7 + $0x140] sm:$0xff]  }
  0x47   :  { %1264 = vmatprep.subr.bf16.mxu1 %v1605_v0 }
  0x48   :  { %1287 = vmatpush3.bf16.msra.mxu0 %v1443_v16 }
  0x49   :  { %1288 = vmatprep.subr.bf16.mxu0 %v1605_v0 }
  0x4a   :  { %1265 = vmatpush3.bf16.msra.mxu1 %v1434_v7  ;;  %v1469_v7 = vld [vmem:[#allocation7 + $0x138] sm:$0xff]  }
  0x4b   :  { %1266 = vmatprep.subr.bf16.mxu1 %v1605_v0 }
  0x4c   :  { %1289 = vmatpush3.bf16.msra.mxu0 %v1444_v17 }
  0x4d   :  { %1290 = vmatprep.subr.bf16.mxu0 %v1605_v0 }
  0x4e   :  { %1267 = vmatpush3.bf16.msra.mxu1 %v1435_v8  ;;  %v1470_v8 = vld [vmem:[#allocation7 + $0x130] sm:$0xff]  }
  0x4f   :  { %1268 = vmatprep.subr.bf16.mxu1 %v1605_v0 }
  0x50   :  { %1291 = vmatpush3.bf16.msra.mxu0 %v1445_v26 }
  0x51   :  { %1292 = vmatprep.subr.bf16.mxu0 %v1605_v0 }
  0x52   :  { %1269 = vmatpush3.bf16.msra.mxu1 %v1436_v9  ;;  %v1471_v9 = vld [vmem:[#allocation7 + $0x128] sm:$0xff]  }
  0x53   :  { %1270 = vmatprep.subr.bf16.mxu1 %v1605_v0 }
  0x54   :  { %1293 = vmatpush3.bf16.msra.mxu0 %v1446_v27 }
  0x55   :  { %1306 = vmatprep.subr.bf16.mxu0 %v1605_v0 }
  0x56   :  { %1271 = vmatpush3.bf16.msra.mxu1 %v1437_v10  ;;  %v636_v10 = vlaneseq }
  0x57   :  { %1272 = vmatprep.subr.bf16.mxu1 %v1605_v0 }
  0x58   :  { %v637_v15 = vshrl.u32 %v636_v10, 7 }
  0x5a   :  { %1273 = vmatpush3.bf16.msra.mxu1 %v1438_v11  ;;  %v639_v11 = vand.u32 127, %v636_v10 }
  0x5b   :  { %1298 = vmatprep.subr.bf16.mxu1 %v1605_v0 }
  0x5c   :  { %v640_v12 = vmul.u32 8, %v639_v11 }
  0x5e   :  { %v642_v16 = vadd.s32 8, %v640_v12  ;;  %vm641_vm3 = vcmp.ge.s32.totalorder %v637_v15, %v640_v12 }
  0x60   :  { %vm643_vm4 = vcmp.lt.s32.totalorder %v637_v15, %v642_v16 }
  0x61   :  { %vm644_vm5 = vmand %vm641_vm3, %vm643_vm4 }
  0x62   :  { %v1145_v26 = vsel %vm644_vm5, 1.0, %v1605_v0 }
  0x63   :  { %v647_v27 = vpack.c.bf16 %v1145_v26, %v1145_v26 }
  0xfd   :  { %v128_v19 = vpop.f32.mrf.mxu1 }
  0xfe   :  { %v129_v20 = vadd.f32 %v1102_v18, %v128_v19 }
  0xff   :  { %v1256_v21 = vpop.f32.mrf.mxu1 }
 0x100   :  { %v134_v22 = vmax.f32 %v129_v20, 0.0  ;;  %v648_v21 = vld [vmem:[#allocation5] sm:$0xf] }
 0x101   :  { %v131_v23 = vpop.f32.mrf.mxu1 }
 0x102   :  { %v135_v24 = vpack.c.bf16 %v134_v22, %v134_v22 }
 0x103   :  { %v1257_v25 = vpop.f32.mrf.mxu1 }
 0x104   :  { %1275 = vmatmul.mubr.bf16.vlgmr.msra.gmra.mxu1 %v135_v24  ;;  %v655_v25 = vsel %vm653_vm2, %v648_v21, 0 }
 0x105   :  { %1302 = vmatprep.mubr.msk.bf16.mxu1 %vm1606_vm0, %v1605_v0  ;;  %1299 = vmatpush3.bf16.msra.mxu1 %v1452_v28  ;;  %v1472_v28 = vld [vmem:[#allocation7 + $0x120] sm:$0xff]  }
 0x106   :  { %1300 = vmatprep.subr.bf16.mxu1 %v1605_v0 }
 0x109   :  { %1301 = vmatpush3.bf16.msra.mxu1 %v1454_v29  ;;  %v1473_v29 = vld [vmem:[#allocation7 + $0x168] sm:$0xff]  }
 0x10a   :  { %1326 = vmatprep.subr.bf16.mxu1 %v1605_v0 }
 0x10c   :  { %1303 = vmatmul.mubr.msk.bf16.vlgmr.msra.gmra.mxu1 %vm90_vm1, %v1652_v3  ;;  %v1465_v3 = vld [vmem:[#allocation7 + $0x158] sm:$0xff]  }
 0x10d   :  { %1342 = vmatprep.mubr.msk.bf16.mxu1 %vm1606_vm0, %v1605_v0  ;;  %1327 = vmatpush3.bf16.msra.mxu1 %v1457_v46  ;;  %v1476_v46 = vld [vmem:[#allocation7 + $0x1e0] sm:$0xff]  }
 0x10e   :  { %1328 = vmatprep.subr.bf16.mxu1 %v1605_v0 }
 0x111   :  { %1329 = vmatpush3.bf16.msra.mxu1 %v1458_v47 }
 0x112   :  { %1330 = vmatprep.subr.bf16.mxu1 %v1605_v0 }
 0x115   :  { %1331 = vmatpush3.bf16.msra.mxu1 %v1459_v48  ;;  %v1486_v48 = vld [vmem:[#allocation7 + $0x190] sm:$0xff]  }
 0x116   :  { %1332 = vmatprep.subr.bf16.mxu1 %v1605_v0 }
 0x119   :  { %1333 = vmatpush3.bf16.msra.mxu1 %v1460_v49  ;;  %v1477_v49 = vld [vmem:[#allocation7 + $0x1d8] sm:$0xff]  }
 0x11a   :  { %1334 = vmatprep.subr.bf16.mxu1 %v1605_v0 }
 0x11d   :  { %1335 = vmatpush3.bf16.msra.mxu1 %v1461_v50  ;;  %v1478_v50 = vld [vmem:[#allocation7 + $0x1d0] sm:$0xff]  }
 0x11e   :  { %1336 = vmatprep.subr.bf16.mxu1 %v1605_v0 }
 0x121   :  { %1337 = vmatpush3.bf16.msra.mxu1 %v1462_v51  ;;  %v1479_v51 = vld [vmem:[#allocation7 + $0x1c8] sm:$0xff]  }
 0x122   :  { %1338 = vmatprep.subr.bf16.mxu1 %v1605_v0 }
 0x125   :  { %1339 = vmatpush3.bf16.msra.mxu1 %v1463_v1 }
 0x126   :  { %1340 = vmatprep.subr.bf16.mxu1 %v1605_v0 }
 0x129   :  { %1341 = vmatpush3.bf16.msra.mxu1 %v1464_v2 }
 0x12a   :  { %1346 = vmatprep.subr.bf16.mxu1 %v1605_v0 }
 0x1c4   :  { %v239_v31 = vpop.f32.mrf.mxu1 }
 0x1c5   :  { %v240_v32 = vadd.f32 %v1106_v30, %v239_v31  ;;  %v1474_v30 = vld [vmem:[#allocation7 + $0x160] sm:$0xff]   ;;  %v1136_v31 = vld [vmem:[#allocation8 + $0x4] ss:$0 sm:$0xff] }
 0x1c6   :  { %v1276_v33 = vpop.f32.mrf.mxu1 }
 0x1c7   :  { %v245_v34 = vmax.f32 %v240_v32, 0.0 }
 0x1c8   :  { %v242_v35 = vpop.f32.mrf.mxu1 }
 0x1c9   :  { %v246_v37 = vpack.c.bf16 %v245_v34, %v245_v34  ;;  %v1483_v35 = vld [vmem:[#allocation7 + $0x1a8] sm:$0xff]  }
 0x1ca   :  { %v1277_v38 = vpop.f32.mrf.mxu1 }
 0x1cb   :  { %1295 = vmatmul.mubr.bf16.vlgmr.msra.gmra.mxu0 %v246_v37 }
 0x1cc   :  { %1307 = vmatpush3.bf16.msra.mxu0 %v1447_v36  ;;  %1322 = vmatprep.mubr.msk.bf16.mxu0 %vm1606_vm0, %v1605_v0  ;;  %v424_v52 = vpop.f32.mrf.mxu1 }
 0x1cd   :  { %1308 = vmatprep.subr.bf16.mxu0 %v1605_v0 }
 0x1ce   :  { %v1304_v53 = vpop.f32.mrf.mxu1 }
 0x1cf   :  { %v1481_v53 = vld [vmem:[#allocation7 + $0x1b8] sm:$0xff]  }
 0x1d0   :  { %1309 = vmatpush3.bf16.msra.mxu0 %v1448_v39  ;;  %v427_v54 = vpop.f32.mrf.mxu1  ;;  %v1484_v39 = vld [vmem:[#allocation7 + $0x1a0] sm:$0xff]  }
 0x1d1   :  { %1310 = vmatprep.subr.bf16.mxu0 %v1605_v0  ;;  %v1482_v54 = vld [vmem:[#allocation7 + $0x1b0] sm:$0xff]  }
 0x1d2   :  { %v1305_v55 = vpop.f32.mrf.mxu1 }
 0x1d3   :  { %v1487_v55 = vld [vmem:[#allocation7 + $0x188] sm:$0xff]  }
 0x1d4   :  { %1311 = vmatpush3.bf16.msra.mxu0 %v1449_v40 }
 0x1d5   :  { %1312 = vmatprep.subr.bf16.mxu0 %v1605_v0 }
 0x1d8   :  { %1313 = vmatpush3.bf16.msra.mxu0 %v1450_v41  ;;  %v1475_v41 = vld [vmem:[#allocation7 + $0x1e8] sm:$0xff]  }
 0x1d9   :  { %1314 = vmatprep.subr.bf16.mxu0 %v1605_v0 }
 0x1dc   :  { %1315 = vmatpush3.bf16.msra.mxu0 %v1451_v42 }
 0x1dd   :  { %1316 = vmatprep.subr.bf16.mxu0 %v1605_v0 }
 0x1e0   :  { %1317 = vmatpush3.bf16.msra.mxu0 %v1453_v43 }
 0x1e1   :  { %1318 = vmatprep.subr.bf16.mxu0 %v1605_v0 }
 0x1e4   :  { %1319 = vmatpush3.bf16.msra.mxu0 %v1455_v44  ;;  %v1485_v44 = vld [vmem:[#allocation7 + $0x198] sm:$0xff]  }
 0x1e5   :  { %1320 = vmatprep.subr.bf16.mxu0 %v1605_v0 }
 0x1e8   :  { %1321 = vmatpush3.bf16.msra.mxu0 %v1456_v45 }
 0x1e9   :  { %1360 = vmatprep.subr.bf16.mxu0 %v1605_v0 }
 0x28b   :  { %v350_v57 = vpop.f32.mrf.mxu0 }
 0x28c   :  { %v351_v58 = vadd.f32 %v1115_v56, %v350_v57  ;;  %v1488_v56 = vld [vmem:[#allocation7 + $0x180] sm:$0xff]   ;;  %v1489_v57 = vld [vmem:[#allocation7 + $0x178] sm:$0xff]  }
 0x28d   :  { %v1296_v59 = vpop.f32.mrf.mxu0 }
 0x28e   :  { %v356_v60 = vmax.f32 %v351_v58, 0.0  ;;  %v1490_v58 = vld [vmem:[#allocation7 + $0x170] sm:$0xff]  }
 0x28f   :  { %v353_v61 = vpop.f32.mrf.mxu0 }
 0x290   :  { %v357_v62 = vpack.c.bf16 %v356_v60, %v356_v60 }
 0x291   :  { %v1297_v63 = vpop.f32.mrf.mxu0 }
 0x292   :  { %1323 = vmatmul.mubr.bf16.vlgmr.msra.gmra.mxu0 %v357_v62  ;;  %v1158_v63 = vld [vmem:[#allocation8 + $0x5] ss:$0 sm:$0xff] }
 0x293   :  { %1376 = vmatprep.mubr.msk.bf16.mxu0 %vm1606_vm0, %v1605_v0  ;;  %1361 = vmatpush3.bf16.msra.mxu0 %v1465_v3 }
 0x294   :  { %1362 = vmatprep.subr.bf16.mxu0 %v1605_v0 }
 0x297   :  { %1363 = vmatpush3.bf16.msra.mxu0 %v1466_v4 }
 0x298   :  { %1364 = vmatprep.subr.bf16.mxu0 %v1605_v0 }
 0x29b   :  { %1365 = vmatpush3.bf16.msra.mxu0 %v1467_v5 }
 0x29c   :  { %1366 = vmatprep.subr.bf16.mxu0 %v1605_v0 }
 0x29f   :  { %1367 = vmatpush3.bf16.msra.mxu0 %v1468_v6 }
 0x2a0   :  { %1368 = vmatprep.subr.bf16.mxu0 %v1605_v0 }
 0x2a3   :  { %1369 = vmatpush3.bf16.msra.mxu0 %v1469_v7 }
 0x2a4   :  { %1370 = vmatprep.subr.bf16.mxu0 %v1605_v0 }
 0x2a7   :  { %1371 = vmatpush3.bf16.msra.mxu0 %v1470_v8 }
 0x2a8   :  { %1372 = vmatprep.subr.bf16.mxu0 %v1605_v0 }
 0x2ab   :  { %1373 = vmatpush3.bf16.msra.mxu0 %v1471_v9 }
 0x2ac   :  { %1374 = vmatprep.subr.bf16.mxu0 %v1605_v0 }
 0x2af   :  { %1375 = vmatpush3.bf16.msra.mxu0 %v1472_v28 }
 0x2b0   :  { %1400 = vmatprep.subr.bf16.mxu0 %v1605_v0 }
 0x352   :  { %v512_v13 = vpop.f32.mrf.mxu0 }
 0x353   :  { %v513_v17 = vadd.f32 %v512_v13, %v424_v52  ;;  %v1480_v52 = vld [vmem:[#allocation7 + $0x1c0] sm:$0xff]   ;;  %v1175_v13 = vld [vmem:[#allocation8 + $0x6] ss:$0 sm:$0xff] }
 0x354   :  { %v1324_v18 = vpop.f32.mrf.mxu0 }
 0x355   :  { %v523_v19 = vadd.f32 %v1135_v14, %v513_v17 }
 0x356   :  { %v515_v20 = vpop.f32.mrf.mxu0 }
 0x357   :  { %v524_v22 = vmax.f32 %v523_v19, 0.0 }
 0x358   :  { %v1325_v23 = vpop.f32.mrf.mxu0 }
 0x359   :  { %v1710_v24 = vpack.c.bf16 %v524_v22, %v524_v22 }
 0x35b   :  { %1343 = vmatmul.mubr.bf16.vlgmr.msra.gmra.mxu1 %v1710_v24 }
 0x35c   :  { %1347 = vmatpush3.bf16.msra.mxu1 %v655_v25  ;;  %1348 = vmatprep.mubr.msk.bf16.mxu1 %vm1606_vm0, %v1605_v0 }
 0x35d   :  { %1352 = vmatprep.subr.bf16.mxu1 %v1605_v0 }
 0x363   :  { %1349 = vmatmul.mubr.msk.bf16.vlgmr.msra.gmra.mxu1 %vm649_vm6, %v647_v27 }
 0x364   :  { %1356 = vmatprep.mubr.msk.bf16.mxu1 %vm1606_vm0, %v1605_v0  ;;  %1353 = vmatpush3.bf16.msra.mxu1 %v1473_v29 }
 0x365   :  { %1354 = vmatprep.subr.bf16.mxu1 %v1605_v0 }
 0x368   :  { %1355 = vmatpush3.bf16.msra.mxu1 %v1474_v30 }
 0x369   :  { %1380 = vmatprep.subr.bf16.mxu1 %v1605_v0 }
 0x41b   :  { %v629_v32 = vpop.f32.mrf.mxu1 }
 0x41c   :  { %v630_v33 = vadd.f32 %v1136_v31, %v629_v32 }
 0x41d   :  { %v1344_v34 = vpop.f32.mrf.mxu1 }
 0x41e   :  { %v635_v36 = vpack.c.bf16 %v630_v33, %v630_v33 }
 0x41f   :  { %v632_v37 = vpop.f32.mrf.mxu1 }
 0x420   :  { %1377 = vmatmul.mubr.bf16.vlgmr.msra.gmra.mxu0 %v635_v36 }
 0x421   :  { %v1345_v38 = vpop.f32.mrf.mxu1  ;;  %1401 = vmatpush3.bf16.msra.mxu0 %v1483_v35  ;;  %1416 = vmatprep.mubr.msk.bf16.mxu0 %vm1606_vm0, %v1605_v0 }
 0x422   :  { %1402 = vmatprep.subr.bf16.mxu0 %v1605_v0 }
 0x423   :  { %v691_v40 = vpop.f32.mrf.mxu1 }
 0x424   :  { %v697_v42 = vpack.c.bf16 %v691_v40, %v691_v40 }
 0x425   :  { %v1350_v43 = vpop.f32.mrf.mxu1  ;;  %1403 = vmatpush3.bf16.msra.mxu0 %v1484_v39 }
 0x426   :  { %1357 = vmatmul.mubr.msk.bf16.vlgmr.msra.gmra.mxu1 %vm90_vm1, %v697_v42  ;;  %1404 = vmatprep.subr.bf16.mxu0 %v1605_v0 }
 0x427   :  { %1381 = vmatpush3.bf16.msra.mxu1 %v1475_v41  ;;  %v694_v45 = vpop.f32.mrf.mxu1  ;;  %1396 = vmatprep.mubr.msk.bf16.mxu1 %vm1606_vm0, %v1605_v0 }
 0x428   :  { %1382 = vmatprep.subr.bf16.mxu1 %v1605_v0 }
 0x429   :  { %v1351_v47 = vpop.f32.mrf.mxu1  ;;  %1405 = vmatpush3.bf16.msra.mxu0 %v1485_v44 }
 0x42a   :  { %1406 = vmatprep.subr.bf16.mxu0 %v1605_v0 }
 0x42b   :  { %1383 = vmatpush3.bf16.msra.mxu1 %v1476_v46 }
 0x42c   :  { %1384 = vmatprep.subr.bf16.mxu1 %v1605_v0 }
 0x42d   :  { %1407 = vmatpush3.bf16.msra.mxu0 %v1486_v48 }
 0x42e   :  { %1408 = vmatprep.subr.bf16.mxu0 %v1605_v0 }
 0x42f   :  { %1385 = vmatpush3.bf16.msra.mxu1 %v1477_v49 }
 0x430   :  { %1386 = vmatprep.subr.bf16.mxu1 %v1605_v0 }
 0x431   :  { %1409 = vmatpush3.bf16.msra.mxu0 %v1487_v55 }
 0x432   :  { %1410 = vmatprep.subr.bf16.mxu0 %v1605_v0 }
 0x433   :  { %1387 = vmatpush3.bf16.msra.mxu1 %v1478_v50 }
 0x434   :  { %1388 = vmatprep.subr.bf16.mxu1 %v1605_v0 }
 0x435   :  { %1411 = vmatpush3.bf16.msra.mxu0 %v1488_v56 }
 0x436   :  { %1412 = vmatprep.subr.bf16.mxu0 %v1605_v0 }
 0x437   :  { %1389 = vmatpush3.bf16.msra.mxu1 %v1479_v51 }
 0x438   :  { %1390 = vmatprep.subr.bf16.mxu1 %v1605_v0 }
 0x439   :  { %1413 = vmatpush3.bf16.msra.mxu0 %v1489_v57 }
 0x43a   :  { %1414 = vmatprep.subr.bf16.mxu0 %v1605_v0 }
 0x43b   :  { %1391 = vmatpush3.bf16.msra.mxu1 %v1480_v52 }
 0x43c   :  { %1392 = vmatprep.subr.bf16.mxu1 %v1605_v0 }
 0x43d   :  { %1415 = vmatpush3.bf16.msra.mxu0 %v1490_v58 }
 0x43f   :  { %1393 = vmatpush3.bf16.msra.mxu1 %v1481_v53 }
 0x440   :  { %1394 = vmatprep.subr.bf16.mxu1 %v1605_v0 }
 0x443   :  { %1395 = vmatpush3.bf16.msra.mxu1 %v1482_v54 }
 0x446   :  { %1397 = vmatmul.mubr.bf16.vlgmr.msra.gmra.mxu1 %v1710_v24 }
 0x4e0   :  { %v855_v59 = vpop.f32.mrf.mxu0 }
 0x4e2   :  { %v1378_v60 = vpop.f32.mrf.mxu0 }
 0x4e4   :  { %v858_v61 = vpop.f32.mrf.mxu0 }
 0x4e6   :  { %v751_v62 = vpop.f32.mrf.mxu1  ;;  %v1379_v1 = vpop.f32.mrf.mxu0 }
 0x4e7   :  { %v856_v2 = vadd.f32 %v855_v59, %v751_v62 }
 0x4e8   :  { %v1358_v3 = vpop.f32.mrf.mxu1 }
 0x4e9   :  { %v866_v4 = vadd.f32 %v1158_v63, %v856_v2 }
 0x4ea   :  { %v754_v5 = vpop.f32.mrf.mxu1 }
 0x4eb   :  { %v867_v6 = vmax.f32 %v866_v4, 0.0 }
 0x4ec   :  { %v1359_v7 = vpop.f32.mrf.mxu1 }
 0x4ed   :  { %v868_v8 = vpack.c.bf16 %v867_v6, %v867_v6 }
 0x4ef   :  { %1417 = vmatmul.mubr.bf16.vlgmr.msra.gmra.mxu0 %v868_v8 }
 0x506   :  { %v983_v9 = vpop.f32.mrf.mxu1 }
 0x508   :  { %v1398_v10 = vpop.f32.mrf.mxu1 }
 0x50a   :  { %v986_v11 = vpop.f32.mrf.mxu1 }
 0x50c   :  { %v1399_v0 = vpop.f32.mrf.mxu1 }
 0x5af   :  { %v1071_v12 = vpop.f32.mrf.mxu0 }
 0x5b0   :  { %v1072_v14 = vadd.f32 %v1071_v12, %v983_v9 }
 0x5b1   :  { %v1418_v15 = vpop.f32.mrf.mxu0 }
 0x5b2   :  { %v1082_v16 = vadd.f32 %v1175_v13, %v1072_v14 }
 0x5b3   :  { %v1074_v17 = vpop.f32.mrf.mxu0 }
 0x5b4   :  { %1084 = vst.msk [vmem:[#allocation10] sm:$0xff] %vm1083_vm7, %v1082_v16 }
 0x5b5   :  { %v1419_v18 = vpop.f32.mrf.mxu0 }
 0x5b6   :  { %1582 = shalt.err (!%p1579_p10)
}
 0x5b7   :  { %1094 = dma.vmem_to_hbm [thread:$0]  %s1092_s3, 128, %s1749_s4, [#allocation4]  }
 0x5b8   :  { %1597 = dma.done.wait [#allocation4], 128  }
 0x5b9   :  { %1598 = vsyncadd [#allocation4], 4294967168 }
 0x5ba   :  { %1098 = vsyncpa [#allocation3], 1 }
 0x5bb   :  { %1099 = vsyncpa [#allocation6], 1 }
 0x5bc   :  { %1100 = vsyncpa [#allocation9], 1 }
 0x5bd   :  { %1101 = vsyncpa [#allocation4], 1 }

</bundles_post_ra>
